<compile_context>
chip_gen: v5e
topology: v5e:2x2
jax: 0.10.0
libtpu: 0.0.40
codegen_flags: <defaults>
</compile_context>

<pallas_src>
import jax
import jax.numpy as jnp
from jax.experimental import pallas as pl
from jax.experimental.pallas import tpu as pltpu


def _sum_kernel(*refs):
    # refs = (x0_ref, ..., x{n-1}_ref, o_ref); each is one (tr, cols) VMEM tile.
    in_refs, o_ref = refs[:-1], refs[-1]
    acc_dtype = (jnp.float32 if jnp.issubdtype(o_ref.dtype, jnp.floating)
                 else o_ref.dtype)
    acc = in_refs[0][...].astype(acc_dtype)
    for r in in_refs[1:]:
        acc = acc + r[...].astype(acc_dtype)
    o_ref[...] = acc.astype(o_ref.dtype)


def _min_sublanes(dtype) -> int:
    """Minimum legal / efficient second-minor tile dim for this dtype."""
    itemsize = jnp.dtype(dtype).itemsize
    if itemsize >= 4:
        return 8
    if itemsize == 2:
        return 16
    return 32


_MIB = 1024 * 1024
_VMEM_BUFFER_BUDGET = 32 * _MIB   # budget for the 2*(N+1) double-buffered tiles
_MAX_TILE_BYTES = 4 * _MIB        # per-buffer cap (overhead amortized by here)
_VMEM_LIMIT_BYTES = 48 * _MIB     # explicit scoped-VMEM limit, safe on all gens


def latent_fusion(latents):
    """Sum a list of identically-shaped latents elementwise (any rank)."""
    n = len(latents)
    orig_shape = latents[0].shape
    dtype = latents[0].dtype
    itemsize = jnp.dtype(dtype).itemsize
    total = 1
    for d in orig_shape:
        total *= d

    # ---- lane-dense 2D slab: (rows, cols), cols a multiple of 128 when
    # possible. Awkward totals fall back to the original last dim as cols
    # (full-extent last block dim is always legal) -- no jnp.pad copies. ----
    cols = None
    for c in (512, 256, 128):
        if total % c == 0:
            cols = c
            break
    if cols is None:
        cols = orig_shape[-1] if len(orig_shape) >= 1 else 1
    rows = total // cols
    slabs = [x.reshape(rows, cols) for x in latents]

    # ---- row-tile size from the VMEM budget as a function of N ----
    min_tr = _min_sublanes(dtype)
    row_bytes = cols * itemsize
    tile_bytes = _VMEM_BUFFER_BUDGET // (2 * (n + 1))
    tile_bytes = max(min(tile_bytes, _MAX_TILE_BYTES), min_tr * row_bytes)

    if rows <= min_tr:
        tr = rows                               # tiny input: one full block
    else:
        tr = max(min_tr, (tile_bytes // row_bytes) // min_tr * min_tr)
        tr = min(tr, (rows // min_tr) * min_tr)
        if tr >= rows:
            # force >= 2 grid steps so both v7x TensorCores get work
            tr = max(min_tr, ((rows // 2) // min_tr) * min_tr)
    grid = (pl.cdiv(rows, tr),)                 # non-divisible tail is masked

    tile_spec = pl.BlockSpec((tr, cols), lambda i: (i, 0))

    out2d = pl.pallas_call(
        _sum_kernel,
        out_shape=jax.ShapeDtypeStruct((rows, cols), dtype),
        grid_spec=pltpu.PrefetchScalarGridSpec(
            num_scalar_prefetch=0,
            grid=grid,
            in_specs=[tile_spec] * n,
            out_specs=tile_spec,
        ),
        compiler_params=pltpu.CompilerParams(
            dimension_semantics=("parallel",),
            vmem_limit_bytes=_VMEM_LIMIT_BYTES,
        ),
        cost_estimate=pl.CostEstimate(
            flops=max(n - 1, 0) * total,
            transcendentals=0,
            bytes_accessed=(n + 1) * total * itemsize,
        ),
    )(*slabs)

    return out2d.reshape(orig_shape)


if __name__ == "__main__":
    key = jax.random.PRNGKey(0)
    B, C, H, W = 2, 4, 16, 16
    N_LATENTS = 3

    keys = jax.random.split(key, N_LATENTS)
    latents = [
        jax.random.normal(k, (B, C, H, W), dtype=jnp.float32) for k in keys
    ]

    fused = latent_fusion(latents)
    fused = jax.block_until_ready(fused)

    # Reference check (pure JAX) — same semantics as torch.stack(...).sum(0).
    ref = jnp.stack(latents, axis=0).sum(axis=0)
    assert fused.shape == (B, C, H, W)
    assert jnp.allclose(fused, ref, atol=1e-6), "mismatch vs reference"

    print("KERNEL_OK")
</pallas_src>

<mosaic_0001>
module attributes {stable_mosaic.version = 11 : i64} {
  func.func @_sum_kernel(%arg0: i32, %arg1: memref<4x512xf32, #tpu.memory_space<vmem>>, %arg2: memref<4x512xf32, #tpu.memory_space<vmem>>, %arg3: memref<4x512xf32, #tpu.memory_space<vmem>>, %arg4: memref<4x512xf32, #tpu.memory_space<vmem>>) attributes {dimension_semantics = [#tpu.dimension_semantics<parallel>], iteration_bounds = array<i64: 1>, scalar_prefetch = 0 : i64, scratch_operands = 0 : i64, tpu.core_type = #tpu.core_type<tc>, window_params = [{transform_indices = @transform_0, window_bounds = array<i64: 4, 512>}, {transform_indices = @transform_1, window_bounds = array<i64: 4, 512>}, {transform_indices = @transform_2, window_bounds = array<i64: 4, 512>}, {transform_indices = @transform_3, window_bounds = array<i64: 4, 512>}]} {
    %c0 = arith.constant 0 : index
    %c0_0 = arith.constant 0 : index
    %0 = vector.load %arg1[%c0, %c0_0] : memref<4x512xf32, #tpu.memory_space<vmem>>, vector<4x512xf32>
    %c0_1 = arith.constant 0 : index
    %c0_2 = arith.constant 0 : index
    %1 = vector.load %arg2[%c0_1, %c0_2] : memref<4x512xf32, #tpu.memory_space<vmem>>, vector<4x512xf32>
    %2 = arith.addf %0, %1 : vector<4x512xf32>
    %c0_3 = arith.constant 0 : index
    %c0_4 = arith.constant 0 : index
    %3 = vector.load %arg3[%c0_3, %c0_4] : memref<4x512xf32, #tpu.memory_space<vmem>>, vector<4x512xf32>
    %4 = arith.addf %2, %3 : vector<4x512xf32>
    %c0_5 = arith.constant 0 : index
    %c0_6 = arith.constant 0 : index
    %5 = vector.load %arg4[%c0_5, %c0_6] : memref<4x512xf32, #tpu.memory_space<vmem>>, vector<4x512xf32>
    tpu.vector_store %arg4[%c0_5, %c0_6], %4 {strides = array<i32>} : memref<4x512xf32, #tpu.memory_space<vmem>>, vector<4x512xf32>,
    return
  }
  func.func @transform_0(%arg0: i32) -> (i32, i32) {
    %c0_i32 = arith.constant 0 : i32
    %c0_i32_0 = arith.constant 0 : i32
    return %arg0, %c0_i32 : i32, i32
  }
  func.func @transform_1(%arg0: i32) -> (i32, i32) {
    %c0_i32 = arith.constant 0 : i32
    %c0_i32_0 = arith.constant 0 : i32
    return %arg0, %c0_i32 : i32, i32
  }
  func.func @transform_2(%arg0: i32) -> (i32, i32) {
    %c0_i32 = arith.constant 0 : i32
    %c0_i32_0 = arith.constant 0 : i32
    return %arg0, %c0_i32 : i32, i32
  }
  func.func @transform_3(%arg0: i32) -> (i32, i32) {
    %c0_i32 = arith.constant 0 : i32
    %c0_i32_0 = arith.constant 0 : i32
    return %arg0, %c0_i32 : i32, i32
  }
}

</mosaic_0001>

<bundles_post_ra>
// kernel: tpu_custom_call.1
= control target key start
LH: loop header
LB: loop body
LE: loop exit
PB: predicated region body
PF: predicated region fallthrough
CT: control target
= control target key end

     0   :  { %8 = vsyncpa [#allocation3], 0  ;;  %s228_s0 = inlined_call_operand.hbm [shape: f32[4,512], index: 0, kind: input, shape index: {}]   ;;  %s229_s1 = inlined_call_operand.hbm [shape: f32[4,512], index: 1, kind: input, shape index: {}]   ;;  %s230_s2 = inlined_call_operand.hbm [shape: f32[4,512], index: 2, kind: input, shape index: {}]   ;;  %s231_s3 = inlined_call_operand.hbm [shape: f32[4,512], index: 3, kind: output, shape index: {}]  }
   0x1   :  { %9 = vsyncpa [#allocation6], 0  ;;  %s27_s14 = sshll.u32 %s229_s1, 4  ;;  %s28_s14 = int_to_ptr.hbm [resolvable:$true] %s27_s14 }
   0x2   :  { %10 = vsyncpa [#allocation4], 0  ;;  %s192_s15 = smov [#allocation5]   ;;  %s16_s19 = sshll.u32 %s228_s0, 4  ;;  %s17_s19 = int_to_ptr.hbm [resolvable:$true] %s16_s19 }
   0x3   :  { %s29_s16 = sshll.u32 %s192_s15, 4  ;;  %s193_s20 = smov [#allocation2]   ;;  %s30_s16 = int_to_ptr.vmem [resolvable:$true] %s29_s16 }
   0x4   :  { %32 = dma.hbm_to_vmem [thread:$0]  %s28_s14, 256, %s30_s16, [#allocation6]  }
   0x5   :  { %s18_s21 = sshll.u32 %s193_s20, 4  ;;  %s38_s24 = sshll.u32 %s230_s2, 4  ;;  %s19_s21 = int_to_ptr.vmem [resolvable:$true] %s18_s21  ;;  %s39_s24 = int_to_ptr.hbm [resolvable:$true] %s38_s24 }
   0x6   :  { %21 = dma.hbm_to_vmem [thread:$0]  %s17_s19, 256, %s19_s21, [#allocation3]  }
   0x7   :  { %s194_s1 = smov [#allocation7]  }
   0x8   :  { %s40_s25 = sshll.u32 %s194_s1, 4  ;;  %s41_s25 = int_to_ptr.vmem [resolvable:$true] %s40_s25 }
   0x9   :  { %43 = dma.hbm_to_vmem [thread:$0]  %s39_s24, 256, %s41_s25, [#allocation6]  }
   0xa   :  { %186 = dma.done.wait [#allocation3], 256  }
   0xb   :  { %187 = vsyncadd [#allocation3], 4294967040 }
   0xc   :  { %188 = dma.done.wait [#allocation6], 512  }
   0xd   :  { %189 = vsyncadd [#allocation6], 4294966784  ;;  %v56_v0 = vld [vmem:[#allocation2] sm:$0xff]  ;;  %v58_v1 = vld [vmem:[#allocation5] sm:$0xff]  ;;  %s195_s0 = smov [#allocation8]   ;;  %s75_s28 = sshll.u32 %s231_s3, 4  ;;  %s76_s28 = int_to_ptr.hbm [resolvable:$true] %s75_s28 }
   0xe   :  { %v62_v2 = vld [vmem:[#allocation7] sm:$0xff]  ;;  %v60_v3 = vadd.f32 %v58_v1, %v56_v0  ;;  %v57_v4 = vld [vmem:[#allocation2 + $0x8] sm:$0xff]  ;;  %v59_v5 = vld [vmem:[#allocation5 + $0x8] sm:$0xff]  ;;  %s73_s2 = sshll.u32 %s195_s0, 4  ;;  %s74_s2 = int_to_ptr.vmem [resolvable:$true] %s73_s2 }
   0xf   :  { %v63_v6 = vld [vmem:[#allocation7 + $0x8] sm:$0xff]  ;;  %v61_v7 = vadd.f32 %v59_v5, %v57_v4 }
  0x10   :  { %v64_v8 = vadd.f32 %v62_v2, %v60_v3 }
  0x11   :  { %v65_v9 = vadd.f32 %v63_v6, %v61_v7 }
  0x12   :  { %66 = vst [vmem:[#allocation8] sm:$0xff] %v64_v8 }
  0x13   :  { %67 = vst [vmem:[#allocation8 + $0x8] sm:$0xff] %v65_v9 }
  0x14   :  { %78 = dma.vmem_to_hbm [thread:$0]  %s74_s2, 256, %s76_s28, [#allocation4]  }
  0x15   :  { %190 = dma.done.wait [#allocation4], 256  }
  0x16   :  { %191 = vsyncadd [#allocation4], 4294967040 }
  0x17   :  { %83 = vsyncpa [#allocation3], 1 }
  0x18   :  { %84 = vsyncpa [#allocation6], 1 }
  0x19   :  { %85 = vsyncpa [#allocation4], 1 }

</bundles_post_ra>
